<compile_context>
chip_gen: v7x
topology: tpu7x:2x2x1
jax: 0.10.0
libtpu: 0.0.40
codegen_flags: <defaults>
</compile_context>

<pallas_src>
import jax
import jax.numpy as jnp
from jax.experimental import pallas as pl
from jax.experimental.pallas import tpu as pltpu

LANE = 128     # lane width (last dim)
MAX_BR = 1024  # max rows (sublanes) per grid step; 2 streams * 2 bufs * 512KiB = 2 MiB VMEM


def _round_up(x, m):
    return ((x + m - 1) // m) * m


def _dice_bce_kernel(x_ref, t_ref, out_ref, acc_ref):
    """Accumulate lane-wise partial sums of [p*t, p, t, bce] over the inner grid axis."""
    i = pl.program_id(1)

    @pl.when(i == 0)
    def _init():
        acc_ref[...] = jnp.zeros_like(acc_ref)

    x = x_ref[...].astype(jnp.float32)   # logits
    t = t_ref[...].astype(jnp.float32)   # targets in [0, 1]

    # Shared transcendental: e = exp(-|x|) drives both sigmoid and stable BCE.
    e = jnp.exp(-jnp.abs(x))
    p = jnp.where(x >= 0.0, 1.0, e) / (1.0 + e)          # sigmoid(x), exact division
    # BCE(sigmoid(x), t) == max(x,0) - x*t + log1p(exp(-|x|))  (numerically stable)
    bce = jnp.maximum(x, 0.0) - x * t + jnp.log1p(e)

    # Reduce along sublanes (XLU) before accumulating -> tiny (4, 128) accumulator.
    part = jnp.concatenate(
        [jnp.sum(p * t, axis=0, keepdims=True),
         jnp.sum(p, axis=0, keepdims=True),
         jnp.sum(t, axis=0, keepdims=True),
         jnp.sum(bce, axis=0, keepdims=True)],
        axis=0,
    )  # (4, LANE)
    acc_ref[...] += part

    @pl.when(i == pl.num_programs(1) - 1)
    def _finalize():
        out_ref[...] = acc_ref[...][None, :, :]


def dice_bce_loss(inputs, targets, smooth=1.0):
    """Pallas TPU implementation of DiceBCELoss.forward (inputs are raw logits)."""
    x = inputs.reshape(-1)
    t = targets.reshape(-1)
    n = x.shape[0]

    rows = -(-n // LANE)                              # ceil(n / 128)
    br = min(MAX_BR, _round_up(rows, 8))              # rows per grid step
    steps = -(-rows // br)
    nc = 2 if steps >= 2 else 1                       # 2-way core split when worthwhile
    steps_per_core = -(-steps // nc)
    rows_padded = nc * steps_per_core * br
    total = rows_padded * LANE
    n_pad = total - n

    if n_pad:
        # Pad logits with -100 and targets with 0: sigmoid(-100) ~ 4e-44 and the BCE
        # term ~ 4e-44, so padded elements contribute (effectively) zero to every sum.
        x = jnp.pad(x, (0, n_pad), constant_values=-100.0)
        t = jnp.pad(t, (0, n_pad), constant_values=0.0)

    x2 = x.reshape(rows_padded, LANE)
    t2 = t.reshape(rows_padded, LANE)

    in_map = lambda c, i: (c * steps_per_core + i, 0)

    part = pl.pallas_call(
        _dice_bce_kernel,
        out_shape=jax.ShapeDtypeStruct((nc, 4, LANE), jnp.float32),
        grid_spec=pltpu.PrefetchScalarGridSpec(
            num_scalar_prefetch=0,
            grid=(nc, steps_per_core),
            in_specs=[
                pl.BlockSpec((br, LANE), in_map),
                pl.BlockSpec((br, LANE), in_map),
            ],
            out_specs=pl.BlockSpec((1, 4, LANE), lambda c, i: (c, 0, 0)),
            scratch_shapes=[pltpu.VMEM((4, LANE), jnp.float32)],
        ),
        compiler_params=pltpu.CompilerParams(
            dimension_semantics=("parallel", "arbitrary")),
    )(x2, t2)

    # Combine per-core, per-lane partials in plain JAX (tiny reduction).
    sums = jnp.sum(part, axis=(0, 2))                  # [intersection, sum_p, sum_t, bce_sum]
    intersection, sum_p, sum_t, bce_sum = sums[0], sums[1], sums[2], sums[3]

    dice_loss = 1.0 - (2.0 * intersection + smooth) / (sum_p + sum_t + smooth)
    bce_mean = bce_sum / float(n)
    return bce_mean + dice_loss


def _dice_bce_ref(inputs, targets, smooth=1.0):
    """Pure-JAX reference matching the PyTorch forward."""
    p = jax.nn.sigmoid(inputs).reshape(-1).astype(jnp.float32)
    t = targets.reshape(-1).astype(jnp.float32)
    intersection = jnp.sum(p * t)
    dice_loss = 1.0 - (2.0 * intersection + smooth) / (jnp.sum(p) + jnp.sum(t) + smooth)
    eps = 1e-12
    bce = -(t * jnp.log(p + eps) + (1.0 - t) * jnp.log(1.0 - p + eps))
    return jnp.mean(bce) + dice_loss


if __name__ == "__main__":
    key = jax.random.PRNGKey(0)
    kx, kt, kx2, kt2 = jax.random.split(key, 4)

    # Small NCHW logits + binary targets (typical nested-UNet segmentation head).
    x = jax.random.normal(kx, (2, 4, 16, 16), dtype=jnp.float32)
    t = jax.random.bernoulli(kt, p=0.5, shape=(2, 4, 16, 16)).astype(jnp.float32)

    loss = jax.block_until_ready(dice_bce_loss(x, t))
    ref = jax.block_until_ready(_dice_bce_ref(x, t))
    assert jnp.isfinite(loss), "kernel produced non-finite loss"
    assert abs(float(loss) - float(ref)) < 1e-4, (float(loss), float(ref))

    # Larger ragged case: exercises padding, multi-step grid, and the 2-way core split.
    x_big = jax.random.normal(kx2, (1, 1, 384, 384), dtype=jnp.float32)
    t_big = jax.random.bernoulli(kt2, p=0.5, shape=(1, 1, 384, 384)).astype(jnp.float32)

    loss_b = jax.block_until_ready(dice_bce_loss(x_big, t_big))
    ref_b = jax.block_until_ready(_dice_bce_ref(x_big, t_big))
    assert jnp.isfinite(loss_b), "kernel produced non-finite loss (big)"
    assert abs(float(loss_b) - float(ref_b)) < 5e-4, (float(loss_b), float(ref_b))

    print("KERNEL_OK")
</pallas_src>

<mosaic_0001>
module attributes {stable_mosaic.version = 11 : i64} {
  func.func @_dice_bce_kernel(%arg0: i32, %arg1: i32, %arg2: memref<16x128xf32, #tpu.memory_space<vmem>>, %arg3: memref<16x128xf32, #tpu.memory_space<vmem>>, %arg4: memref<1x4x128xf32, #tpu.memory_space<vmem>>, %arg5: memref<4x128xf32, #tpu.memory_space<vmem>>) attributes {dimension_semantics = [#tpu.dimension_semantics<parallel>, #tpu.dimension_semantics<arbitrary>], iteration_bounds = array<i64: 1, 1>, scalar_prefetch = 0 : i64, scratch_operands = 1 : i64, tpu.core_type = #tpu.core_type<tc>, window_params = [{transform_indices = @transform_0, window_bounds = array<i64: 16, 128>}, {transform_indices = @transform_1, window_bounds = array<i64: 16, 128>}, {transform_indices = @transform_2, window_bounds = array<i64: 1, 4, 128>}]} {
    %c0_i32 = arith.constant 0 : i32
    %0 = arith.cmpi eq, %arg1, %c0_i32 : i32
    %1 = arith.extui %0 : i1 to i32
    %c0_i32_0 = arith.constant 0 : i32
    %2 = arith.cmpi ne, %1, %c0_i32_0 : i32
    scf.if %2 {
      %cst_18 = arith.constant 0.000000e+00 : f32
      %38 = vector.broadcast %cst_18 : f32 to vector<4x128xf32>
      %c0_19 = arith.constant 0 : index
      %c0_20 = arith.constant 0 : index
      %39 = vector.load %arg5[%c0_19, %c0_20] : memref<4x128xf32, #tpu.memory_space<vmem>>, vector<4x128xf32>
      tpu.vector_store %arg5[%c0_19, %c0_20], %38 {strides = array<i32>} : memref<4x128xf32, #tpu.memory_space<vmem>>, vector<4x128xf32>,
    } else {
    }
    %c0 = arith.constant 0 : index
    %c0_1 = arith.constant 0 : index
    %3 = vector.load %arg2[%c0, %c0_1] : memref<16x128xf32, #tpu.memory_space<vmem>>, vector<16x128xf32>
    %c0_2 = arith.constant 0 : index
    %c0_3 = arith.constant 0 : index
    %4 = vector.load %arg3[%c0_2, %c0_3] : memref<16x128xf32, #tpu.memory_space<vmem>>, vector<16x128xf32>
    %5 = math.absf %3 : vector<16x128xf32>
    %cst = arith.constant 0.000000e+00 : f32
    %6 = vector.broadcast %cst : f32 to vector<16x128xf32>
    %7 = arith.subf %6, %5 : vector<16x128xf32>
    %8 = math.exp %7 : vector<16x128xf32>
    %cst_4 = arith.constant 0.000000e+00 : f32
    %9 = vector.broadcast %cst_4 : f32 to vector<16x128xf32>
    %10 = arith.cmpf oge, %3, %9 : vector<16x128xf32>
    %cst_5 = arith.constant 1.000000e+00 : f32
    %11 = vector.broadcast %cst_5 : f32 to vector<16x128xf32>
    %12 = arith.select %10, %11, %8 : vector<16x128xi1>, vector<16x128xf32>
    %cst_6 = arith.constant 1.000000e+00 : f32
    %13 = vector.broadcast %cst_6 : f32 to vector<16x128xf32>
    %14 = arith.addf %13, %8 : vector<16x128xf32>
    %15 = arith.divf %12, %14 : vector<16x128xf32>
    %cst_7 = arith.constant 0.000000e+00 : f32
    %16 = vector.broadcast %cst_7 : f32 to vector<16x128xf32>
    %17 = arith.maximumf %3, %16 : vector<16x128xf32>
    %18 = arith.mulf %3, %4 : vector<16x128xf32>
    %19 = arith.subf %17, %18 : vector<16x128xf32>
    %20 = math.log1p %8 : vector<16x128xf32>
    %21 = arith.addf %19, %20 : vector<16x128xf32>
    %22 = arith.mulf %15, %4 : vector<16x128xf32>
    %cst_8 = arith.constant dense<0.000000e+00> : vector<128xf32>
    %23 = vector.multi_reduction <add>, %22, %cst_8 [0] : vector<16x128xf32> to vector<128xf32>
    %24 = vector.shape_cast %23 : vector<128xf32> to vector<1x128xf32>
    %cst_9 = arith.constant dense<0.000000e+00> : vector<128xf32>
    %25 = vector.multi_reduction <add>, %15, %cst_9 [0] : vector<16x128xf32> to vector<128xf32>
    %26 = vector.shape_cast %25 : vector<128xf32> to vector<1x128xf32>
    %cst_10 = arith.constant dense<0.000000e+00> : vector<128xf32>
    %27 = vector.multi_reduction <add>, %4, %cst_10 [0] : vector<16x128xf32> to vector<128xf32>
    %28 = vector.shape_cast %27 : vector<128xf32> to vector<1x128xf32>
    %cst_11 = arith.constant dense<0.000000e+00> : vector<128xf32>
    %29 = vector.multi_reduction <add>, %21, %cst_11 [0] : vector<16x128xf32> to vector<128xf32>
    %30 = vector.shape_cast %29 : vector<128xf32> to vector<1x128xf32>
    %31 = tpu.concatenate %24, %26, %28, %30 in 0 : vector<1x128xf32>, vector<1x128xf32>, vector<1x128xf32>, vector<1x128xf32> -> vector<4x128xf32>
    %c0_12 = arith.constant 0 : index
    %c0_13 = arith.constant 0 : index
    %32 = vector.load %arg5[%c0_12, %c0_13] : memref<4x128xf32, #tpu.memory_space<vmem>>, vector<4x128xf32>
    %33 = arith.addf %32, %31 : vector<4x128xf32>
    %c0_14 = arith.constant 0 : index
    %c0_15 = arith.constant 0 : index
    %34 = vector.load %arg5[%c0_14, %c0_15] : memref<4x128xf32, #tpu.memory_space<vmem>>, vector<4x128xf32>
    tpu.vector_store %arg5[%c0_14, %c0_15], %33 {strides = array<i32>} : memref<4x128xf32, #tpu.memory_space<vmem>>, vector<4x128xf32>,
    %c0_i32_16 = arith.constant 0 : i32
    %35 = arith.cmpi eq, %arg1, %c0_i32_16 : i32
    %36 = arith.extui %35 : i1 to i32
    %c0_i32_17 = arith.constant 0 : i32
    %37 = arith.cmpi ne, %36, %c0_i32_17 : i32
    scf.if %37 {
      %c0_18 = arith.constant 0 : index
      %c0_19 = arith.constant 0 : index
      %38 = vector.load %arg5[%c0_18, %c0_19] : memref<4x128xf32, #tpu.memory_space<vmem>>, vector<4x128xf32>
      %39 = vector.shape_cast %38 : vector<4x128xf32> to vector<1x4x128xf32>
      %c0_20 = arith.constant 0 : index
      %c0_21 = arith.constant 0 : index
      %c0_22 = arith.constant 0 : index
      %40 = vector.load %arg4[%c0_20, %c0_21, %c0_22] : memref<1x4x128xf32, #tpu.memory_space<vmem>>, vector<1x4x128xf32>
      tpu.vector_store %arg4[%c0_20, %c0_21, %c0_22], %39 {strides = array<i32>} : memref<1x4x128xf32, #tpu.memory_space<vmem>>, vector<1x4x128xf32>,
    } else {
    }
    return
  }
  func.func @transform_0(%arg0: i32, %arg1: i32) -> (i32, i32) {
    %c1_i32 = arith.constant 1 : i32
    %0 = arith.muli %arg0, %c1_i32 : i32
    %1 = arith.addi %0, %arg1 : i32
    %c0_i32 = arith.constant 0 : i32
    %c0_i32_0 = arith.constant 0 : i32
    return %1, %c0_i32 : i32, i32
  }
  func.func @transform_1(%arg0: i32, %arg1: i32) -> (i32, i32) {
    %c1_i32 = arith.constant 1 : i32
    %0 = arith.muli %arg0, %c1_i32 : i32
    %1 = arith.addi %0, %arg1 : i32
    %c0_i32 = arith.constant 0 : i32
    %c0_i32_0 = arith.constant 0 : i32
    return %1, %c0_i32 : i32, i32
  }
  func.func @transform_2(%arg0: i32, %arg1: i32) -> (i32, i32, i32) {
    %c0_i32 = arith.constant 0 : i32
    %c0_i32_0 = arith.constant 0 : i32
    %c0_i32_1 = arith.constant 0 : i32
    return %arg0, %c0_i32, %c0_i32_0 : i32, i32, i32
  }
}

</mosaic_0001>

<bundles_post_ra>
// kernel: tpu_custom_call.1
= control target key start
LH: loop header
LB: loop body
LE: loop exit
PB: predicated region body
PF: predicated region fallthrough
CT: control target
= control target key end

     0   :  { %7 = vsyncpa [#allocation4], 0  ;;  %s312_s0 = inlined_call_operand.hbm [shape: f32[16,128], index: 0, kind: input, shape index: {}]   ;;  %s313_s1 = inlined_call_operand.hbm [shape: f32[16,128], index: 1, kind: input, shape index: {}]   ;;  %s314_s2 = inlined_call_operand.hbm [shape: f32[1,4,128], index: 2, kind: output, shape index: {}]  }
   0x1   :  { %8 = vsyncpa [#allocation7], 0 }
   0x2   :  { %9 = vsyncpa [#allocation5], 0  ;;  %s255_s9 = smov [#allocation3]   ;;  %s183_s13 = scalar_lea.hbm %s312_s0, 256 }
   0x3   :  { %s19_s10 = sshll.u32 %s255_s9, 4  ;;  %p184_p0 = scmp.ne.s32.totalorder %s312_s0, %s183_s13  ;;  %s20_s10 = int_to_ptr.vmem [resolvable:$true] %s19_s10 }
   0x4   :  { %p187_p1 = scmp.lt.u32.totalorder %s183_s13, %s312_s0 }
   0x6   :  { %p189_p2 = pnand %p187_p1, %p184_p0 }
   0x8   :  { %192 = shalt.err (!%p189_p2)
}
   0x9   :  { %s193_s18 = scalar_lea.vmem %s20_s10, 256  ;;  %p198_p4 = scmp.lt.s32.totalorder %s20_s10, %s20_s10 }
   0xa   :  { %p194_p3 = scmp.ne.s32.totalorder %s20_s10, %s193_s18  ;;  %p199_p5 = scmp.lt.s32.totalorder %s193_s18, %s193_s18 }
   0xc   :  { %p200_p6 = por %p199_p5, %p198_p4 }
   0xe   :  { %p201_p7 = pnand %p200_p6, %p194_p3 }
  0x10   :  { %204 = shalt.err (!%p201_p7)
}
  0x11   :  { %s256_s19 = smov 128   ;;  %s257_s20 = smov 8  }
  0x12   :  { %25 = dma.hbm_to_vmem [thread:$0]  %s312_s0, 256, %s20_s10, [#allocation4], %s256_s19, %s256_s19, %s257_s20  }
  0x13   :  { %s258_s23 = smov [#allocation6]   ;;  %s205_s27 = scalar_lea.hbm %s313_s1, 256 }
  0x14   :  { %s35_s24 = sshll.u32 %s258_s23, 4  ;;  %p206_p8 = scmp.ne.s32.totalorder %s313_s1, %s205_s27  ;;  %s36_s24 = int_to_ptr.vmem [resolvable:$true] %s35_s24 }
  0x15   :  { %p209_p9 = scmp.lt.u32.totalorder %s205_s27, %s313_s1 }
  0x17   :  { %p211_p10 = pnand %p209_p9, %p206_p8 }
  0x19   :  { %214 = shalt.err (!%p211_p10)
}
  0x1a   :  { %s215_s4 = scalar_lea.vmem %s36_s24, 256  ;;  %p220_p12 = scmp.lt.s32.totalorder %s36_s24, %s36_s24 }
  0x1b   :  { %p216_p11 = scmp.ne.s32.totalorder %s36_s24, %s215_s4  ;;  %p221_p13 = scmp.lt.s32.totalorder %s215_s4, %s215_s4 }
  0x1d   :  { %p222_p0 = por %p221_p13, %p220_p12 }
  0x1f   :  { %p223_p1 = pnand %p222_p0, %p216_p11 }
  0x21   :  { %226 = shalt.err (!%p223_p1)
}
  0x22   :  { %41 = dma.hbm_to_vmem [thread:$0]  %s313_s1, 256, %s36_s24, [#allocation7], %s256_s19, %s256_s19, %s257_s20  }
  0x23   :  { %249 = dma.done.wait [#allocation4], 256  }
  0x24   :  { %250 = vsyncadd [#allocation4], 4294967040 }
  0x25   :  { %251 = dma.done.wait [#allocation7], 256  }
  0x26   :  { %252 = vsyncadd [#allocation7], 4294967040  ;;  %v259_v0 = vmov 0.0   ;;  %v57_v1 = vld [vmem:[#allocation3] sm:$0xff]  ;;  %v58_v2 = vld [vmem:[#allocation3 + $0x8] sm:$0xff]  ;;  %vm135_vm4 = vcmask 1040384  }
  0x27   :  { %56 = vst [vmem:[#allocation2] sm:$0xf] %v259_v0  ;;  %v61_v3 = vand.u32 2147483647, %v57_v1  ;;  %v62_v4 = vand.u32 2147483647, %v58_v2 }
  0x28   :  { %v59_v13 = vld [vmem:[#allocation6] sm:$0xff]  ;;  %v60_v14 = vld [vmem:[#allocation6 + $0x8] sm:$0xff]  ;;  %vm69_vm0 = vcmp.ge.f32.partialorder %v57_v1, 0.0  ;;  %vm70_vm1 = vcmp.ge.f32.partialorder %v58_v2, 0.0  ;;  %v79_v22 = vmax.f32 %v57_v1, 0.0  ;;  %v80_v26 = vmax.f32 %v58_v2, 0.0 }
  0x29   :  { %v63_v5 = vsub.f32 0.0, %v61_v3  ;;  %v64_v6 = vsub.f32 0.0, %v62_v4  ;;  %v121_v16 = vadd.f32 %v60_v14, %v59_v13  ;;  %v81_v18 = vmul.f32 %v59_v13, %v57_v1  ;;  %s260_s1 = smov [#allocation8]  }
  0x2a   :  { %v82_v27 = vmul.f32 %v60_v14, %v58_v2  ;;  %vm137_vm5 = vcmask 1041408   ;;  %vm139_vm6 = vcmask 1042432   ;;  %s155_s6 = sshll.u32 %s260_s1, 4  ;;  %s156_s6 = int_to_ptr.vmem [resolvable:$true] %s155_s6 }
  0x2b   :  { %v65_v7 = vmul.f32 1.442695, %v63_v5  ;;  %v67_v8 = vmul.f32 1.442695, %v64_v6  ;;  %v122_v20 = vrot.slane %v121_v16, 4  ;;  %v83_v36 = vsub.f32 %v79_v22, %v81_v18  ;;  %s227_s7 = scalar_lea.vmem %s156_s6, 64  ;;  %p232_p3 = scmp.lt.s32.totalorder %s156_s6, %s156_s6 }
  0x2c   :  { %v84_v39 = vsub.f32 %v80_v26, %v82_v27  ;;  %p228_p2 = scmp.ne.s32.totalorder %s156_s6, %s227_s7  ;;  %p233_p4 = scmp.lt.s32.totalorder %s227_s7, %s227_s7 }
  0x2d   :  { %171 = vpow2.f32 %v65_v7  ;;  %v123_v33 = vadd.f32 %v122_v20, %v121_v16 }
  0x2e   :  { %173 = vpow2.f32 %v67_v8  ;;  %p234_p5 = por %p233_p4, %p232_p3 }
  0x2f   :  { %v124_v46 = vrot.slane %v123_v33, 2 }
  0x30   :  { %p235_p6 = pnand %p234_p5, %p228_p2 }
  0x31   :  { %v125_v54 = vadd.f32 %v124_v46, %v123_v33 }
  0x33   :  { %v126_v61 = vrot.slane %v125_v54, 1 }
  0x35   :  { %v127_v4 = vadd.f32 %v126_v61, %v125_v54 }
  0x37   :  { %v172_v9 = vpop.eup %171 }
  0x38   :  { %v174_v10 = vpop.eup %173  ;;  %v73_v11 = vadd.f32 1.0, %v172_v9  ;;  %v88_v15 = vmul.f32 -0.5, %v172_v9  ;;  %v71_v21 = vsel %vm69_vm0, 1.0, %v172_v9  ;;  %v91_v23 = vand.u32 2147483647, %v172_v9 }
  0x39   :  { %v74_v12 = vadd.f32 1.0, %v174_v10  ;;  %v97_v17 = vmul.f32 -0.5, %v174_v10  ;;  %v72_v25 = vsel %vm70_vm1, 1.0, %v174_v10  ;;  %v100_v28 = vand.u32 2147483647, %v174_v10 }
  0x3a   :  { %175 = vrcp.f32 %v73_v11  ;;  %v89_v19 = vadd.f32 1.0, %v88_v15  ;;  %vm92_vm2 = vcmp.lt.f32.partialorder %v91_v23, 0.0004427343 }
  0x3b   :  { %177 = vrcp.f32 %v74_v12  ;;  %v98_v24 = vadd.f32 1.0, %v97_v17  ;;  %vm101_vm3 = vcmp.lt.f32.partialorder %v100_v28, 0.0004427343 }
  0x3c   :  { %179 = vlog2.f32 %v73_v11  ;;  %v90_v32 = vmul.f32 %v172_v9, %v89_v19  ;;  %v141_v11 = vld [vmem:[#allocation2] sm:$0xf] }
  0x3d   :  { %181 = vlog2.f32 %v74_v12  ;;  %v99_v37 = vmul.f32 %v174_v10, %v98_v24 }
  0x44   :  { %v176_v29 = vpop.eup %175 }
  0x45   :  { %v178_v30 = vpop.eup %177  ;;  %v76_v31 = vmul.f32 %v176_v29, %v71_v21 }
  0x46   :  { %v180_v34 = vpop.eup %179  ;;  %v78_v35 = vmul.f32 %v178_v30, %v72_v25 }
  0x47   :  { %v182_v38 = vpop.eup %181  ;;  %v87_v40 = vmul.f32 0.6931472, %v180_v34  ;;  %v105_v41 = vmul.f32 %v76_v31, %v59_v13 }
  0x48   :  { %v96_v42 = vmul.f32 0.6931472, %v182_v38  ;;  %v106_v43 = vmul.f32 %v78_v35, %v60_v14  ;;  %v114_v44 = vadd.f32 %v78_v35, %v76_v31 }
  0x49   :  { %v93_v45 = vsel %vm92_vm2, %v90_v32, %v87_v40 }
  0x4a   :  { %v102_v47 = vsel %vm101_vm3, %v99_v37, %v96_v42  ;;  %v103_v48 = vadd.f32 %v93_v45, %v83_v36  ;;  %v107_v49 = vadd.f32 %v106_v43, %v105_v41  ;;  %v115_v50 = vrot.slane %v114_v44, 4 }
  0x4b   :  { %v104_v51 = vadd.f32 %v102_v47, %v84_v39 }
  0x4c   :  { %v108_v52 = vrot.slane %v107_v49, 4  ;;  %v116_v53 = vadd.f32 %v115_v50, %v114_v44 }
  0x4d   :  { %v128_v55 = vadd.f32 %v104_v51, %v103_v48 }
  0x4e   :  { %v109_v56 = vadd.f32 %v108_v52, %v107_v49  ;;  %v117_v57 = vrot.slane %v116_v53, 2 }
  0x4f   :  { %v129_v58 = vrot.slane %v128_v55, 4 }
  0x50   :  { %v110_v59 = vrot.slane %v109_v56, 2  ;;  %v118_v60 = vadd.f32 %v117_v57, %v116_v53 }
  0x51   :  { %v130_v62 = vadd.f32 %v129_v58, %v128_v55 }
  0x52   :  { %v111_v63 = vadd.f32 %v110_v59, %v109_v56  ;;  %v119_v0 = vrot.slane %v118_v60, 1 }
  0x53   :  { %v131_v1 = vrot.slane %v130_v62, 2 }
  0x54   :  { %v112_v2 = vrot.slane %v111_v63, 1  ;;  %v120_v3 = vadd.f32 %v119_v0, %v118_v60 }
  0x55   :  { %v132_v5 = vadd.f32 %v131_v1, %v130_v62 }
  0x56   :  { %v113_v6 = vadd.f32 %v112_v2, %v111_v63 }
  0x57   :  { %v133_v7 = vrot.slane %v132_v5, 1 }
  0x58   :  { %v136_v8 = vsel %vm135_vm4, %v113_v6, %v120_v3 }
  0x59   :  { %v134_v9 = vadd.f32 %v133_v7, %v132_v5  ;;  %v138_v10 = vsel %vm137_vm5, %v136_v8, %v127_v4 }
  0x5b   :  { %v140_v12 = vsel %vm139_vm6, %v138_v10, %v134_v9 }
  0x5c   :  { %v142_v13 = vadd.f32 %v141_v11, %v140_v12 }
  0x5e   :  { %143 = vst [vmem:[#allocation2] sm:$0xf] %v142_v13 }
  0x65   :  { %v147_v14 = vld [vmem:[#allocation2] sm:$0xf] }
  0x66   :  { %148 = vst [vmem:[#allocation8] sm:$0xf] %v147_v14 }
  0x67   :  { %238 = shalt.err (!%p235_p6)
}
  0x68   :  { %s239_s10 = scalar_lea.hbm %s314_s2, 64 }
  0x69   :  { %p240_p7 = scmp.ne.s32.totalorder %s314_s2, %s239_s10  ;;  %p243_p8 = scmp.lt.u32.totalorder %s239_s10, %s314_s2 }
  0x6b   :  { %p245_p9 = pnand %p243_p8, %p240_p7 }
  0x6d   :  { %248 = shalt.err (!%p245_p9)
}
  0x6e   :  { %158 = dma.vmem_to_hbm [thread:$0]  %s156_s6, 64, %s314_s2, [#allocation5]  }
  0x6f   :  { %253 = dma.done.wait [#allocation5], 64  }
  0x70   :  { %254 = vsyncadd [#allocation5], 4294967232 }
  0x71   :  { %162 = vsyncpa [#allocation4], 1 }
  0x72   :  { %163 = vsyncpa [#allocation7], 1 }
  0x73   :  { %164 = vsyncpa [#allocation5], 1 }

</bundles_post_ra>
